<compile_context>
chip_gen: v7x
topology: tpu7x:2x2x1
jax: 0.10.0
libtpu: 0.0.40
codegen_flags: <defaults>
</compile_context>

<pallas_src>
from functools import lru_cache, partial

import jax
import jax.numpy as jnp
from jax.experimental import pallas as pl
from jax.experimental.pallas import tpu as pltpu

NEG_SLOPE = 0.01   # PyTorch nn.LeakyReLU default
LANE = 128
SUBLANE = 8
POOL_CHUNK = 512   # lane width of each pooling partial-sum chunk


def _leaky_relu(x):
    return jnp.where(x > 0, x, NEG_SLOPE * x)


def _round_up(n, m):
    return ((n + m - 1) // m) * m


def _pad_axis(a, axis, multiple):
    pad = (-a.shape[axis]) % multiple
    if pad == 0:
        return a
    widths = [(0, 0)] * a.ndim
    widths[axis] = (0, pad)
    return jnp.pad(a, widths)


@lru_cache(maxsize=None)
def _tpu_vmem_and_cores():
    """Physical VMEM per TensorCore and TensorCores per chip (generation-aware)."""
    vmem_cap = 128 * 1024 * 1024  # v5e / v6e default
    try:
        info = pltpu.get_tpu_info()
        vmem_cap = int(getattr(info, "vmem_capacity_bytes", vmem_cap))
    except Exception:
        pass
    kind = ""
    try:
        kind = jax.devices()[0].device_kind.lower()
    except Exception:
        pass
    # v7x: 2 TensorCores per chip and only 64 MiB VMEM per core.
    num_tc = 2 if ("v7" in kind or vmem_cap <= 80 * 1024 * 1024) else 1
    return vmem_cap, num_tc


def _choose_batch_tile(batch, per_row_bytes, fixed_bytes, vmem_cap, num_tc):
    """Largest batch tile whose steady-state working set fits ~70% of physical VMEM.

    Keeps the x stream fully double-buffered on every generation.  On multi-core
    chips (v7x) the tile is additionally capped at ceil(B / num_tc) so the
    "parallel" batch axis always has >= num_tc grid steps (extra step ~0.35 us,
    far cheaper than leaving a TensorCore idle).  The tile stays a multiple of 8
    (or equals B) because it is the sublane dim of the 2-D output blocks.
    """
    budget = int(vmem_cap * 0.70) - fixed_bytes
    tb = max(1, budget // max(1, per_row_bytes))
    if num_tc > 1 and batch > 1:
        tb = min(tb, max(SUBLANE, -(-batch // num_tc)))
    if tb >= batch:
        return batch
    return max(SUBLANE, (tb // SUBLANE) * SUBLANE)


def head_kernel(x_ref, w1_ref, b1_ref, w2_ref, b2_ref, o_ref, feat_ref):
    tb, C, HW = x_ref.shape
    in_p = feat_ref.shape[-1]

    # ---- AdaptiveAvgPool2d(1): chunked f32 accumulation over HW.
    # Avoids materializing a full-tile f32 copy of x (2x VMEM for bf16 inputs); only a
    # (tb, C, chunk) temp is live per chunk.  Chunk offsets/sizes are static, so this
    # unrolls to a handful of VALU partial adds + one XLU reduce each (no dynamic
    # lane slicing).  (If XLU ever binds on v7x, the sum could instead be an
    # (tb*C, HW) @ ones(HW, 1) MXU dot.)
    chunk = POOL_CHUNK if HW > POOL_CHUNK else HW
    n_full, tail = divmod(HW, chunk)

    def chunk_sum(start, size):
        blk = x_ref[:, :, start:start + size].astype(jnp.float32)
        return jnp.sum(blk, axis=-1)

    acc = jnp.zeros((tb, C), jnp.float32)
    for c in range(n_full):                      # static trip count (HW // chunk)
        acc = acc + chunk_sum(c * chunk, chunk)
    if tail:
        acc = acc + chunk_sum(n_full * chunk, tail)
    pooled = acc * (1.0 / HW)

    # Lane-pad pooled to in_p (128 multiple): feat store is unmasked / lane-dense and
    # the same array is the MXU LHS.  Pads are zeros -> exact numerics.
    if in_p > C:
        pooled = jnp.concatenate(
            [pooled, jnp.zeros((tb, in_p - C), jnp.float32)], axis=-1)

    # ---- MLP: Linear -> LeakyReLU -> Linear (all dims lane-padded; pads are zeros).
    h = jnp.dot(pooled, w1_ref[...], preferred_element_type=jnp.float32) + b1_ref[...]
    h = _leaky_relu(h)
    out = jnp.dot(h, w2_ref[...], preferred_element_type=jnp.float32) + b2_ref[...]

    o_ref[...] = out.astype(o_ref.dtype)
    feat_ref[...] = pooled.astype(feat_ref.dtype)
    # TODO(synk): nn.Dropout(0.2) is identity in eval mode; training-mode stochastic
    #             dropout (pltpu.prng_*) is intentionally not implemented here.


@partial(jax.jit, static_argnames=("single_buffer_weights",))
def head_forward(x_nchw, w1, b1, w2, b2, *, single_buffer_weights=True):
    """Head.forward.  Weights stored as (in_features, out_features); biases as (1, out)."""
    B, C, H, W = x_nchw.shape
    HW = H * W
    in_f, hidden = w1.shape
    out_f = w2.shape[1]
    assert in_f == C, (in_f, C)

    # Free reshape (NCHW -> (B, C, H*W)); keep native dtype, no extra HBM pass.
    # NOTE: if the backbone can emit NHWC-flattened (B, HW, C) with C a 128-multiple,
    # prefer streaming that layout (lane-dense x, pooling becomes sublane adds); do NOT
    # add an HBM-side transpose here just for that.
    x = x_nchw.reshape(B, C, HW)

    # Zero-pad MLP dims to 128 lanes (exact numerics; sliced back below).
    in_p = _round_up(C, LANE)
    hidden_p = _round_up(hidden, LANE)
    out_p = _round_up(out_f, LANE)
    w1p = _pad_axis(_pad_axis(w1.astype(jnp.float32), 0, LANE), 1, LANE)  # (in_p, hidden_p)
    b1p = _pad_axis(b1.astype(jnp.float32), 1, LANE)                      # (1, hidden_p)
    w2p = _pad_axis(_pad_axis(w2.astype(jnp.float32), 0, LANE), 1, LANE)  # (hidden_p, out_p)
    b2p = _pad_axis(b2.astype(jnp.float32), 1, LANE)                      # (1, out_p)

    # ---- Generation-aware tiling / VMEM budget.
    vmem_cap, num_tc = _tpu_vmem_and_cores()
    chunk = min(HW, POOL_CHUNK)
    per_row_bytes = (
        2 * C * HW * x.dtype.itemsize        # double-buffered x tile stream
        + C * chunk * 4                      # f32 chunk temp in the pooling loop
        + 2 * (out_p + in_p) * 4             # double-buffered output blocks
        + (in_p + hidden_p + out_p) * 4      # pooled / h / out f32 temps
    )
    w_buffers = 1 if single_buffer_weights else 2
    fixed_bytes = w_buffers * 4 * (w1p.size + b1p.size + w2p.size + b2p.size)
    tb = _choose_batch_tile(B, per_row_bytes, fixed_bytes, vmem_cap, num_tc)
    grid = (pl.cdiv(B, tb),)
    # ~75% of physical VMEM: ~48 MiB on v7x (64 MiB), ~96 MiB on v5e/v6e (128 MiB).
    vmem_limit = int(min(vmem_cap * 0.75, 100 * 1024 * 1024))

    def weight_spec(shape):
        # Grid-invariant inputs: request single buffering to reclaim the dead second
        # copy (index_map is constant so there is no re-DMA either way).
        if single_buffer_weights:
            return pl.BlockSpec(shape, lambda i: (0, 0), pipeline_mode=pl.Buffered(1))
        return pl.BlockSpec(shape, lambda i: (0, 0))

    flops = 2 * B * (in_p * hidden_p + hidden_p * out_p) + B * C * HW
    bytes_accessed = (
        x.size * x.dtype.itemsize
        + (w1p.size + b1p.size + w2p.size + b2p.size) * 4
        + B * (out_p + in_p) * 4
    )

    # When B % tb != 0 the last grid step loads undefined rows and computes garbage for
    # them, but those rows fall outside (B, ...) and are discarded by the pipeline.
    out_padded, feat_padded = pl.pallas_call(
        head_kernel,
        out_shape=(
            jax.ShapeDtypeStruct((B, out_p), jnp.float32),
            jax.ShapeDtypeStruct((B, in_p), jnp.float32),
        ),
        grid_spec=pl.GridSpec(
            grid=grid,
            in_specs=[
                pl.BlockSpec((tb, C, HW), lambda i: (i, 0, 0)),
                weight_spec(w1p.shape),
                weight_spec(b1p.shape),
                weight_spec(w2p.shape),
                weight_spec(b2p.shape),
            ],
            out_specs=(
                pl.BlockSpec((tb, out_p), lambda i: (i, 0)),
                pl.BlockSpec((tb, in_p), lambda i: (i, 0)),
            ),
        ),
        compiler_params=pltpu.CompilerParams(
            dimension_semantics=("parallel",),
            vmem_limit_bytes=vmem_limit,
        ),
        cost_estimate=pl.CostEstimate(
            flops=flops, transcendentals=0, bytes_accessed=bytes_accessed
        ),
    )(x, w1p, b1p, w2p, b2p)

    logits = out_padded[:, :out_f]
    x_feat = feat_padded[:, :C]
    return logits, x_feat


def run_head(x, params):
    """Call the fused head; fall back to default double-buffered weight specs if this
    JAX version does not support pipeline_mode=pl.Buffered(1) on pallas_call."""
    try:
        return jax.block_until_ready(head_forward(x, *params, single_buffer_weights=True))
    except Exception:
        return jax.block_until_ready(head_forward(x, *params, single_buffer_weights=False))


def init_params(key, in_f, hidden_dim, out_f):
    """Deterministic PyTorch-Linear-style init; weights stored as (in, out), biases (1, out)."""
    def linear(k, fan_in, fan_out):
        kw, kb = jax.random.split(k)
        bound = 1.0 / (fan_in ** 0.5)
        w = jax.random.uniform(kw, (fan_in, fan_out), jnp.float32, -bound, bound)
        b = jax.random.uniform(kb, (1, fan_out), jnp.float32, -bound, bound)
        return w, b

    k1, k2 = jax.random.split(key)
    w1, b1 = linear(k1, in_f, hidden_dim)
    w2, b2 = linear(k2, hidden_dim, out_f)
    return w1, b1, w2, b2


def _reference(x_nchw, w1, b1, w2, b2):
    pooled = jnp.mean(x_nchw.astype(jnp.float32), axis=(2, 3))  # (B, C)
    h = _leaky_relu(pooled @ w1 + b1)
    return h @ w2 + b2, pooled


if __name__ == "__main__":
    B, in_f, H, W = 2, 16, 16, 16
    hidden_dim, out_f = 32, 8

    key = jax.random.PRNGKey(0)
    kx, kp = jax.random.split(key)
    x = jax.random.normal(kx, (B, in_f, H, W), dtype=jnp.float32)  # NCHW
    params = init_params(kp, in_f, hidden_dim, out_f)

    logits, feat = run_head(x, params)

    ref_logits, ref_feat = _reference(x, *params)
    assert logits.shape == (B, out_f), logits.shape
    assert feat.shape == (B, in_f), feat.shape
    assert jnp.allclose(logits, ref_logits, atol=1e-5, rtol=1e-5), "logits mismatch"
    assert jnp.allclose(feat, ref_feat, atol=1e-5, rtol=1e-5), "x_feat mismatch"

    print("KERNEL_OK")
</pallas_src>

<mosaic_0001>
module attributes {stable_mosaic.version = 11 : i64} {
  func.func @head_kernel(%arg0: i32, %arg1: memref<2x16x256xf32, #tpu.memory_space<vmem>>, %arg2: memref<128x128xf32, #tpu.memory_space<vmem>>, %arg3: memref<1x128xf32, #tpu.memory_space<vmem>>, %arg4: memref<128x128xf32, #tpu.memory_space<vmem>>, %arg5: memref<1x128xf32, #tpu.memory_space<vmem>>, %arg6: memref<2x128xf32, #tpu.memory_space<vmem>>, %arg7: memref<2x128xf32, #tpu.memory_space<vmem>>) attributes {dimension_semantics = [#tpu.dimension_semantics<parallel>], iteration_bounds = array<i64: 1>, scalar_prefetch = 0 : i64, scratch_operands = 0 : i64, tpu.core_type = #tpu.core_type<tc>, window_params = [{transform_indices = @transform_0, window_bounds = array<i64: 2, 16, 256>}, {pipeline_mode = #tpu.pipeline_mode<synchronous>, transform_indices = @transform_1, window_bounds = array<i64: 128, 128>}, {pipeline_mode = #tpu.pipeline_mode<synchronous>, transform_indices = @transform_2, window_bounds = array<i64: 1, 128>}, {pipeline_mode = #tpu.pipeline_mode<synchronous>, transform_indices = @transform_3, window_bounds = array<i64: 128, 128>}, {pipeline_mode = #tpu.pipeline_mode<synchronous>, transform_indices = @transform_4, window_bounds = array<i64: 1, 128>}, {transform_indices = @transform_5, window_bounds = array<i64: 2, 128>}, {transform_indices = @transform_6, window_bounds = array<i64: 2, 128>}]} {
    %cst = arith.constant 0.000000e+00 : f32
    %0 = vector.broadcast %cst : f32 to vector<2x16xf32>
    %c0 = arith.constant 0 : index
    %c0_0 = arith.constant 0 : index
    %c0_1 = arith.constant 0 : index
    %1 = vector.load %arg1[%c0, %c0_0, %c0_1] : memref<2x16x256xf32, #tpu.memory_space<vmem>>, vector<2x16x256xf32>
    %cst_2 = arith.constant dense<0.000000e+00> : vector<2x16xf32>
    %2 = vector.multi_reduction <add>, %1, %cst_2 [2] : vector<2x16x256xf32> to vector<2x16xf32>
    %3 = arith.addf %0, %2 : vector<2x16xf32>
    %cst_3 = arith.constant 3.906250e-03 : f32
    %4 = vector.broadcast %cst_3 : f32 to vector<2x16xf32>
    %5 = arith.mulf %3, %4 : vector<2x16xf32>
    %cst_4 = arith.constant 0.000000e+00 : f32
    %6 = vector.broadcast %cst_4 : f32 to vector<2x112xf32>
    %7 = tpu.concatenate %5, %6 in 1 : vector<2x16xf32>, vector<2x112xf32> -> vector<2x128xf32>
    %c0_5 = arith.constant 0 : index
    %c0_6 = arith.constant 0 : index
    %8 = vector.load %arg2[%c0_5, %c0_6] : memref<128x128xf32, #tpu.memory_space<vmem>>, vector<128x128xf32>
    %cst_7 = arith.constant dense<0.000000e+00> : vector<2x128xf32>
    %9 = tpu.matmul %7, %8, %cst_7 {dimension_numbers = #tpu.dot_dimension_numbers<[1], [0], [0], [1], [0, 0, 1, 1], [], []>} : vector<2x128xf32>, vector<128x128xf32>, vector<2x128xf32> -> vector<2x128xf32>
    %c0_8 = arith.constant 0 : index
    %c0_9 = arith.constant 0 : index
    %10 = vector.load %arg3[%c0_8, %c0_9] : memref<1x128xf32, #tpu.memory_space<vmem>>, vector<1x128xf32>
    %11 = vector.broadcast %10 : vector<1x128xf32> to vector<2x128xf32>
    %12 = arith.addf %9, %11 : vector<2x128xf32>
    %cst_10 = arith.constant 0.000000e+00 : f32
    %13 = vector.broadcast %cst_10 : f32 to vector<2x128xf32>
    %14 = arith.cmpf ogt, %12, %13 : vector<2x128xf32>
    %cst_11 = arith.constant 0.00999999977 : f32
    %15 = vector.broadcast %cst_11 : f32 to vector<2x128xf32>
    %16 = arith.mulf %15, %12 : vector<2x128xf32>
    %17 = arith.select %14, %12, %16 : vector<2x128xi1>, vector<2x128xf32>
    %c0_12 = arith.constant 0 : index
    %c0_13 = arith.constant 0 : index
    %18 = vector.load %arg4[%c0_12, %c0_13] : memref<128x128xf32, #tpu.memory_space<vmem>>, vector<128x128xf32>
    %cst_14 = arith.constant dense<0.000000e+00> : vector<2x128xf32>
    %19 = tpu.matmul %17, %18, %cst_14 {dimension_numbers = #tpu.dot_dimension_numbers<[1], [0], [0], [1], [0, 0, 1, 1], [], []>} : vector<2x128xf32>, vector<128x128xf32>, vector<2x128xf32> -> vector<2x128xf32>
    %c0_15 = arith.constant 0 : index
    %c0_16 = arith.constant 0 : index
    %20 = vector.load %arg5[%c0_15, %c0_16] : memref<1x128xf32, #tpu.memory_space<vmem>>, vector<1x128xf32>
    %21 = vector.broadcast %20 : vector<1x128xf32> to vector<2x128xf32>
    %22 = arith.addf %19, %21 : vector<2x128xf32>
    %c0_17 = arith.constant 0 : index
    %c0_18 = arith.constant 0 : index
    %23 = vector.load %arg6[%c0_17, %c0_18] : memref<2x128xf32, #tpu.memory_space<vmem>>, vector<2x128xf32>
    tpu.vector_store %arg6[%c0_17, %c0_18], %22 {strides = array<i32>} : memref<2x128xf32, #tpu.memory_space<vmem>>, vector<2x128xf32>,
    %c0_19 = arith.constant 0 : index
    %c0_20 = arith.constant 0 : index
    %24 = vector.load %arg7[%c0_19, %c0_20] : memref<2x128xf32, #tpu.memory_space<vmem>>, vector<2x128xf32>
    tpu.vector_store %arg7[%c0_19, %c0_20], %7 {strides = array<i32>} : memref<2x128xf32, #tpu.memory_space<vmem>>, vector<2x128xf32>,
    return
  }
  func.func @transform_0(%arg0: i32) -> (i32, i32, i32) {
    %c0_i32 = arith.constant 0 : i32
    %c0_i32_0 = arith.constant 0 : i32
    %c0_i32_1 = arith.constant 0 : i32
    return %arg0, %c0_i32, %c0_i32_0 : i32, i32, i32
  }
  func.func @transform_1(%arg0: i32) -> (i32, i32) {
    %c0_i32 = arith.constant 0 : i32
    %c0_i32_0 = arith.constant 0 : i32
    %c0_i32_1 = arith.constant 0 : i32
    return %c0_i32, %c0_i32_0 : i32, i32
  }
  func.func @transform_2(%arg0: i32) -> (i32, i32) {
    %c0_i32 = arith.constant 0 : i32
    %c0_i32_0 = arith.constant 0 : i32
    %c0_i32_1 = arith.constant 0 : i32
    return %c0_i32, %c0_i32_0 : i32, i32
  }
  func.func @transform_3(%arg0: i32) -> (i32, i32) {
    %c0_i32 = arith.constant 0 : i32
    %c0_i32_0 = arith.constant 0 : i32
    %c0_i32_1 = arith.constant 0 : i32
    return %c0_i32, %c0_i32_0 : i32, i32
  }
  func.func @transform_4(%arg0: i32) -> (i32, i32) {
    %c0_i32 = arith.constant 0 : i32
    %c0_i32_0 = arith.constant 0 : i32
    %c0_i32_1 = arith.constant 0 : i32
    return %c0_i32, %c0_i32_0 : i32, i32
  }
  func.func @transform_5(%arg0: i32) -> (i32, i32) {
    %c0_i32 = arith.constant 0 : i32
    %c0_i32_0 = arith.constant 0 : i32
    return %arg0, %c0_i32 : i32, i32
  }
  func.func @transform_6(%arg0: i32) -> (i32, i32) {
    %c0_i32 = arith.constant 0 : i32
    %c0_i32_0 = arith.constant 0 : i32
    return %arg0, %c0_i32 : i32, i32
  }
}

module attributes {stable_mosaic.version = 11 : i64} {
  func.func @head_kernel(%arg0: i32, %arg1: memref<2x16x256xf32, #tpu.memory_space<vmem>>, %arg2: memref<128x128xf32, #tpu.memory_space<vmem>>, %arg3: memref<1x128xf32, #tpu.memory_space<vmem>>, %arg4: memref<128x128xf32, #tpu.memory_space<vmem>>, %arg5: memref<1x128xf32, #tpu.memory_space<vmem>>, %arg6: memref<2x128xf32, #tpu.memory_space<vmem>>, %arg7: memref<2x128xf32, #tpu.memory_space<vmem>>) attributes {dimension_semantics = [#tpu.dimension_semantics<parallel>], iteration_bounds = array<i64: 1>, scalar_prefetch = 0 : i64, scratch_operands = 0 : i64, tpu.core_type = #tpu.core_type<tc>, window_params = [{transform_indices = @transform_0, window_bounds = array<i64: 2, 16, 256>}, {pipeline_mode = #tpu.pipeline_mode<synchronous>, transform_indices = @transform_1, window_bounds = array<i64: 128, 128>}, {pipeline_mode = #tpu.pipeline_mode<synchronous>, transform_indices = @transform_2, window_bounds = array<i64: 1, 128>}, {pipeline_mode = #tpu.pipeline_mode<synchronous>, transform_indices = @transform_3, window_bounds = array<i64: 128, 128>}, {pipeline_mode = #tpu.pipeline_mode<synchronous>, transform_indices = @transform_4, window_bounds = array<i64: 1, 128>}, {transform_indices = @transform_5, window_bounds = array<i64: 2, 128>}, {transform_indices = @transform_6, window_bounds = array<i64: 2, 128>}]} {
    %cst = arith.constant 0.000000e+00 : f32
    %0 = vector.broadcast %cst : f32 to vector<2x16xf32>
    %c0 = arith.constant 0 : index
    %c0_0 = arith.constant 0 : index
    %c0_1 = arith.constant 0 : index
    %1 = vector.load %arg1[%c0, %c0_0, %c0_1] : memref<2x16x256xf32, #tpu.memory_space<vmem>>, vector<2x16x256xf32>
    %cst_2 = arith.constant dense<0.000000e+00> : vector<2x16xf32>
    %2 = vector.multi_reduction <add>, %1, %cst_2 [2] : vector<2x16x256xf32> to vector<2x16xf32>
    %3 = arith.addf %0, %2 : vector<2x16xf32>
    %cst_3 = arith.constant 3.906250e-03 : f32
    %4 = vector.broadcast %cst_3 : f32 to vector<2x16xf32>
    %5 = arith.mulf %3, %4 : vector<2x16xf32>
    %cst_4 = arith.constant 0.000000e+00 : f32
    %6 = vector.broadcast %cst_4 : f32 to vector<2x112xf32>
    %7 = tpu.concatenate %5, %6 in 1 : vector<2x16xf32>, vector<2x112xf32> -> vector<2x128xf32>
    %c0_5 = arith.constant 0 : index
    %c0_6 = arith.constant 0 : index
    %8 = vector.load %arg2[%c0_5, %c0_6] : memref<128x128xf32, #tpu.memory_space<vmem>>, vector<128x128xf32>
    %cst_7 = arith.constant dense<0.000000e+00> : vector<2x128xf32>
    %9 = tpu.matmul %7, %8, %cst_7 {dimension_numbers = #tpu.dot_dimension_numbers<[1], [0], [0], [1], [0, 0, 1, 1], [], []>} : vector<2x128xf32>, vector<128x128xf32>, vector<2x128xf32> -> vector<2x128xf32>
    %c0_8 = arith.constant 0 : index
    %c0_9 = arith.constant 0 : index
    %10 = vector.load %arg3[%c0_8, %c0_9] : memref<1x128xf32, #tpu.memory_space<vmem>>, vector<1x128xf32>
    %11 = vector.broadcast %10 : vector<1x128xf32> to vector<2x128xf32>
    %12 = arith.addf %9, %11 : vector<2x128xf32>
    %cst_10 = arith.constant 0.000000e+00 : f32
    %13 = vector.broadcast %cst_10 : f32 to vector<2x128xf32>
    %14 = arith.cmpf ogt, %12, %13 : vector<2x128xf32>
    %cst_11 = arith.constant 0.00999999977 : f32
    %15 = vector.broadcast %cst_11 : f32 to vector<2x128xf32>
    %16 = arith.mulf %15, %12 : vector<2x128xf32>
    %17 = arith.select %14, %12, %16 : vector<2x128xi1>, vector<2x128xf32>
    %c0_12 = arith.constant 0 : index
    %c0_13 = arith.constant 0 : index
    %18 = vector.load %arg4[%c0_12, %c0_13] : memref<128x128xf32, #tpu.memory_space<vmem>>, vector<128x128xf32>
    %cst_14 = arith.constant dense<0.000000e+00> : vector<2x128xf32>
    %19 = tpu.matmul %17, %18, %cst_14 {dimension_numbers = #tpu.dot_dimension_numbers<[1], [0], [0], [1], [0, 0, 1, 1], [], []>} : vector<2x128xf32>, vector<128x128xf32>, vector<2x128xf32> -> vector<2x128xf32>
    %c0_15 = arith.constant 0 : index
    %c0_16 = arith.constant 0 : index
    %20 = vector.load %arg5[%c0_15, %c0_16] : memref<1x128xf32, #tpu.memory_space<vmem>>, vector<1x128xf32>
    %21 = vector.broadcast %20 : vector<1x128xf32> to vector<2x128xf32>
    %22 = arith.addf %19, %21 : vector<2x128xf32>
    %c0_17 = arith.constant 0 : index
    %c0_18 = arith.constant 0 : index
    %23 = vector.load %arg6[%c0_17, %c0_18] : memref<2x128xf32, #tpu.memory_space<vmem>>, vector<2x128xf32>
    tpu.vector_store %arg6[%c0_17, %c0_18], %22 {strides = array<i32>} : memref<2x128xf32, #tpu.memory_space<vmem>>, vector<2x128xf32>,
    %c0_19 = arith.constant 0 : index
    %c0_20 = arith.constant 0 : index
    %24 = vector.load %arg7[%c0_19, %c0_20] : memref<2x128xf32, #tpu.memory_space<vmem>>, vector<2x128xf32>
    tpu.vector_store %arg7[%c0_19, %c0_20], %7 {strides = array<i32>} : memref<2x128xf32, #tpu.memory_space<vmem>>, vector<2x128xf32>,
    return
  }
  func.func @transform_0(%arg0: i32) -> (i32, i32, i32) {
    %c0_i32 = arith.constant 0 : i32
    %c0_i32_0 = arith.constant 0 : i32
    %c0_i32_1 = arith.constant 0 : i32
    return %arg0, %c0_i32, %c0_i32_0 : i32, i32, i32
  }
  func.func @transform_1(%arg0: i32) -> (i32, i32) {
    %c0_i32 = arith.constant 0 : i32
    %c0_i32_0 = arith.constant 0 : i32
    %c0_i32_1 = arith.constant 0 : i32
    return %c0_i32, %c0_i32_0 : i32, i32
  }
  func.func @transform_2(%arg0: i32) -> (i32, i32) {
    %c0_i32 = arith.constant 0 : i32
    %c0_i32_0 = arith.constant 0 : i32
    %c0_i32_1 = arith.constant 0 : i32
    return %c0_i32, %c0_i32_0 : i32, i32
  }
  func.func @transform_3(%arg0: i32) -> (i32, i32) {
    %c0_i32 = arith.constant 0 : i32
    %c0_i32_0 = arith.constant 0 : i32
    %c0_i32_1 = arith.constant 0 : i32
    return %c0_i32, %c0_i32_0 : i32, i32
  }
  func.func @transform_4(%arg0: i32) -> (i32, i32) {
    %c0_i32 = arith.constant 0 : i32
    %c0_i32_0 = arith.constant 0 : i32
    %c0_i32_1 = arith.constant 0 : i32
    return %c0_i32, %c0_i32_0 : i32, i32
  }
  func.func @transform_5(%arg0: i32) -> (i32, i32) {
    %c0_i32 = arith.constant 0 : i32
    %c0_i32_0 = arith.constant 0 : i32
    return %arg0, %c0_i32 : i32, i32
  }
  func.func @transform_6(%arg0: i32) -> (i32, i32) {
    %c0_i32 = arith.constant 0 : i32
    %c0_i32_0 = arith.constant 0 : i32
    return %arg0, %c0_i32 : i32, i32
  }
}

</mosaic_0001>

<bundles_post_ra>
// kernel: head_forward.1
= control target key start
LH: loop header
LB: loop body
LE: loop exit
PB: predicated region body
PF: predicated region fallthrough
CT: control target
= control target key end

     0   :  { %12 = vsyncpa [#allocation3], 0  ;;  %s851_s0 = inlined_call_operand.hbm [shape: f32[2,16,256], index: 0, kind: input, shape index: {}]   ;;  %s852_s1 = inlined_call_operand.hbm [shape: f32[128,128], index: 1, kind: input, shape index: {}]   ;;  %s853_s2 = inlined_call_operand.hbm [shape: f32[1,128], index: 2, kind: input, shape index: {}]   ;;  %s854_s3 = inlined_call_operand.hbm [shape: f32[128,128], index: 3, kind: input, shape index: {}]   ;;  %s855_s4 = inlined_call_operand.hbm [shape: f32[1,128], index: 4, kind: input, shape index: {}]   ;;  %s856_s5 = inlined_call_operand.hbm [shape: f32[2,128], index: 5, kind: output, shape index: {0}]   ;;  %s857_s6 = inlined_call_operand.hbm [shape: f32[2,128], index: 6, kind: output, shape index: {1}]  }
   0x1   :  { %13 = vsyncpa [#allocation6], 0 }
   0x2   :  { %14 = vsyncpa [#allocation9], 0 }
   0x3   :  { %15 = vsyncpa [#allocation4], 0 }
   0x4   :  { %16 = vsyncpa [#allocation13], 0  ;;  %s702_s21 = smov [#allocation5]   ;;  %s538_s25 = scalar_lea.hbm %s852_s1, 2048 }
   0x5   :  { %s34_s22 = sshll.u32 %s702_s21, 4  ;;  %p539_p0 = scmp.ne.s32.totalorder %s852_s1, %s538_s25  ;;  %s35_s22 = int_to_ptr.vmem [resolvable:$true] %s34_s22 }
   0x6   :  { %p542_p1 = scmp.lt.u32.totalorder %s538_s25, %s852_s1 }
   0x8   :  { %p544_p2 = pnand %p542_p1, %p539_p0 }
   0xa   :  { %547 = shalt.err (!%p544_p2)
}
   0xb   :  { %s548_s30 = scalar_lea.vmem %s35_s22, 2048  ;;  %p553_p4 = scmp.lt.s32.totalorder %s35_s22, %s35_s22 }
   0xc   :  { %p549_p3 = scmp.ne.s32.totalorder %s35_s22, %s548_s30  ;;  %p554_p5 = scmp.lt.s32.totalorder %s548_s30, %s548_s30 }
   0xe   :  { %p555_p6 = por %p554_p5, %p553_p4 }
  0x10   :  { %p556_p7 = pnand %p555_p6, %p549_p3 }
  0x12   :  { %559 = shalt.err (!%p556_p7)
}
  0x13   :  { %s703_s7 = smov 128   ;;  %s704_s8 = smov 8  }
  0x14   :  { %40 = dma.hbm_to_vmem [thread:$0]  %s852_s1, 2048, %s35_s22, [#allocation6], %s703_s7, %s703_s7, %s704_s8  }
  0x15   :  { %s705_s11 = smov [#allocation8]   ;;  %s706_s13 = smov [#allocation2]  }
  0x16   :  { %s56_s12 = sshll.u32 %s705_s11, 4  ;;  %s22_s14 = sshll.u32 %s706_s13, 4  ;;  %s57_s12 = int_to_ptr.vmem [resolvable:$true] %s56_s12  ;;  %s23_s14 = int_to_ptr.vmem [resolvable:$true] %s22_s14 }
  0x17   :  { %s560_s17 = scalar_lea.hbm %s854_s3, 2048 }
  0x18   :  { %p561_p8 = scmp.ne.s32.totalorder %s854_s3, %s560_s17  ;;  %p564_p9 = scmp.lt.u32.totalorder %s560_s17, %s854_s3 }
  0x1a   :  { %p566_p10 = pnand %p564_p9, %p561_p8 }
  0x1c   :  { %569 = shalt.err (!%p566_p10)
}
  0x1d   :  { %s570_s1 = scalar_lea.vmem %s57_s12, 2048  ;;  %p575_p12 = scmp.lt.s32.totalorder %s57_s12, %s57_s12 }
  0x1e   :  { %p571_p11 = scmp.ne.s32.totalorder %s57_s12, %s570_s1  ;;  %p576_p13 = scmp.lt.s32.totalorder %s570_s1, %s570_s1 }
  0x20   :  { %p577_p0 = por %p576_p13, %p575_p12 }
  0x22   :  { %p578_p1 = pnand %p577_p0, %p571_p11 }
  0x24   :  { %581 = shalt.err (!%p578_p1)
}
  0x25   :  { %62 = dma.hbm_to_vmem [thread:$0]  %s854_s3, 2048, %s57_s12, [#allocation9], %s703_s7, %s703_s7, %s704_s8  }
  0x26   :  { %s582_s26 = scalar_lea.hbm %s851_s0, 1024 }
  0x27   :  { %p583_p2 = scmp.ne.s32.totalorder %s851_s0, %s582_s26  ;;  %p586_p3 = scmp.lt.u32.totalorder %s582_s26, %s851_s0 }
  0x29   :  { %p588_p4 = pnand %p586_p3, %p583_p2 }
  0x2b   :  { %591 = shalt.err (!%p588_p4)
}
  0x2c   :  { %s592_s9 = scalar_lea.vmem %s23_s14, 1024  ;;  %p597_p6 = scmp.lt.s32.totalorder %s23_s14, %s23_s14 }
  0x2d   :  { %p593_p5 = scmp.ne.s32.totalorder %s23_s14, %s592_s9  ;;  %p598_p7 = scmp.lt.s32.totalorder %s592_s9, %s592_s9 }
  0x2f   :  { %p599_p8 = por %p598_p7, %p597_p6 }
  0x31   :  { %p600_p9 = pnand %p599_p8, %p593_p5 }
  0x33   :  { %603 = shalt.err (!%p600_p9)
}
  0x34   :  { %s707_s3 = smov 256   ;;  %s708_s7 = smov 16  }
  0x35   :  { %28 = dma.hbm_to_vmem [thread:$0]  %s851_s0, 1024, %s23_s14, [#allocation3], %s707_s3, %s707_s3, %s708_s7  }
  0x36   :  { %s709_s11 = smov [#allocation7]   ;;  %s710_s13 = smov [#allocation10]  }
  0x37   :  { %s47_s12 = sshll.u32 %s709_s11, 4  ;;  %s69_s15 = sshll.u32 %s710_s13, 4  ;;  %s48_s12 = int_to_ptr.vmem [resolvable:$true] %s47_s12  ;;  %s70_s15 = int_to_ptr.vmem [resolvable:$true] %s69_s15 }
  0x38   :  { %s604_s18 = scalar_lea.hbm %s853_s2, 16 }
  0x39   :  { %p605_p10 = scmp.ne.s32.totalorder %s853_s2, %s604_s18  ;;  %p608_p11 = scmp.lt.u32.totalorder %s604_s18, %s853_s2 }
  0x3b   :  { %p610_p12 = pnand %p608_p11, %p605_p10 }
  0x3d   :  { %613 = shalt.err (!%p610_p12)
}
  0x3e   :  { %s614_s0 = scalar_lea.vmem %s48_s12, 16  ;;  %s618_s14 = scalar_lea.vmem %s48_s12, 32 }
  0x3f   :  { %p615_p13 = scmp.ne.s32.totalorder %s48_s12, %s614_s0  ;;  %p619_p0 = scmp.lt.s32.totalorder %s48_s12, %s48_s12 }
  0x40   :  { %p620_p1 = scmp.lt.s32.totalorder %s618_s14, %s614_s0 }
  0x42   :  { %p621_p2 = por %p620_p1, %p619_p0 }
  0x44   :  { %p622_p3 = pnand %p621_p2, %p615_p13 }
  0x46   :  { %625 = shalt.err (!%p622_p3)
}
  0x47   :  { %50 = dma.hbm_to_vmem [thread:$0]  %s853_s2, 16, %s48_s12, [#allocation6]  }
  0x48   :  { %s626_s26 = scalar_lea.hbm %s855_s4, 16 }
  0x49   :  { %p627_p4 = scmp.ne.s32.totalorder %s855_s4, %s626_s26  ;;  %p630_p5 = scmp.lt.u32.totalorder %s626_s26, %s855_s4 }
  0x4b   :  { %p632_p6 = pnand %p630_p5, %p627_p4 }
  0x4d   :  { %635 = shalt.err (!%p632_p6)
}
  0x4e   :  { %s636_s9 = scalar_lea.vmem %s70_s15, 16  ;;  %s640_s3 = scalar_lea.vmem %s70_s15, 32 }
  0x4f   :  { %p637_p7 = scmp.ne.s32.totalorder %s70_s15, %s636_s9  ;;  %p641_p8 = scmp.lt.s32.totalorder %s70_s15, %s70_s15 }
  0x50   :  { %p642_p9 = scmp.lt.s32.totalorder %s640_s3, %s636_s9 }
  0x52   :  { %p643_p10 = por %p642_p9, %p641_p8 }
  0x54   :  { %p644_p11 = pnand %p643_p10, %p637_p7 }
  0x56   :  { %647 = shalt.err (!%p644_p11)
}
  0x57   :  { %72 = dma.hbm_to_vmem [thread:$0]  %s855_s4, 16, %s70_s15, [#allocation9]  }
  0x58   :  { %692 = dma.done.wait [#allocation3], 1024  }
  0x59   :  { %693 = vsyncadd [#allocation3], 4294966272 }
  0x5a   :  { %694 = dma.done.wait [#allocation6], 2064  }
  0x5b   :  { %695 = vsyncadd [#allocation6], 4294965232 }
  0x5c   :  { %696 = dma.done.wait [#allocation9], 2064  }
  0x5d   :  { %697 = vsyncadd [#allocation9], 4294965232  ;;  %v711_v0 = vmov 0.0|0.0   ;;  %v92_v1 = vld [vmem:[#allocation2 + $0x20] sm:$0xff]  ;;  %v93_v2 = vld [vmem:[#allocation2 + $0x28] sm:$0xff]  ;;  %vm712_vm0 = vmmov 0   ;;  %v120_v59 = vlaneseq }
  0x5e   :  { %476 = vmatprep.subr.bf16.mxu0 %v711_v0  ;;  %500 = vmatprep.subr.bf16.mxu1 %v711_v0  ;;  %v88_v3 = vld [vmem:[#allocation2] sm:$0xff]  ;;  %v102_v4 = vadd.f32 %v93_v2, %v92_v1  ;;  %v89_v5 = vld [vmem:[#allocation2 + $0x8] sm:$0xff]  ;;  %v94_v6 = vld [vmem:[#allocation2 + $0x30] sm:$0xff]  ;;  %v713_v33 = vmov 0.0   ;;  %vm131_vm1 = vcmask 130112   ;;  %vm142_vm2 = vcmask 1041409  }
  0x5f   :  { %v95_v7 = vld [vmem:[#allocation2 + $0x38] sm:$0xff]  ;;  %v96_v8 = vadd.f32 %v89_v5, %v88_v3  ;;  %v90_v9 = vld [vmem:[#allocation2 + $0x10] sm:$0xff]  ;;  %v147_v11 = vld [vmem:[#allocation5] sm:$0xff]  ;;  %438 = vmatprep.mubr.msk.f32.mxu0 %vm712_vm0, %v713_v33  ;;  %473 = vmatprep.mubr.msk.f32.mxu1 %vm712_vm0, %v713_v33  ;;  %v121_v60 = vand.u32 127, %v120_v59  ;;  %v123_v61 = vshrl.u32 %v120_v59, 7  ;;  %vm145_vm3 = vcmask 130048  }
  0x60   :  { %v91_v10 = vld [vmem:[#allocation2 + $0x18] sm:$0xff]  ;;  %103 = vadd.xlane.f32.xlu1 %v102_v4  ;;  %v105_v12 = vadd.f32 %v95_v7, %v94_v6  ;;  %v148_v13 = vld [vmem:[#allocation5 + $0x8] sm:$0xff]  ;;  %v149_v14 = vld [vmem:[#allocation5 + $0x10] sm:$0xff]  ;;  %s714_s4 = smov [#allocation12]  }
  0x61   :  { %v150_v15 = vld [vmem:[#allocation5 + $0x18] sm:$0xff]  ;;  %97 = vadd.xlane.f32.xlu0 %v96_v8  ;;  %v99_v16 = vadd.f32 %v91_v10, %v90_v9  ;;  %v477_v17 = vpack.c.bf16 %v148_v13, %v147_v11  ;;  %v151_v19 = vld [vmem:[#allocation5 + $0x20] sm:$0xff]  ;;  %v152_v20 = vld [vmem:[#allocation5 + $0x28] sm:$0xff]  ;;  %v126_v62 = vadd.s32 4294967288, %v121_v60  ;;  %v124_v2 = vsub.s32 %v121_v60, %v123_v61  ;;  %s354_s8 = sshll.u32 %s714_s4, 4  ;;  %s355_s8 = int_to_ptr.vmem [resolvable:$true] %s354_s8 }
  0x62   :  { %v480_v18 = vpack.c.bf16 %v150_v15, %v149_v14  ;;  %v483_v21 = vpack.c.bf16 %v152_v20, %v151_v19  ;;  %v153_v22 = vld [vmem:[#allocation5 + $0x30] sm:$0xff]  ;;  %v154_v23 = vld [vmem:[#allocation5 + $0x38] sm:$0xff]  ;;  %v155_v25 = vld [vmem:[#allocation5 + $0x40] sm:$0xff]  ;;  %s648_s10 = scalar_lea.vmem %s355_s8, 32  ;;  %p653_p13 = scmp.lt.s32.totalorder %s355_s8, %s355_s8 }
  0x63   :  { %478 = vmatpush3.bf16.msra.mxu0 %v477_v17  ;;  %v486_v24 = vpack.c.bf16 %v154_v23, %v153_v22  ;;  %v156_v26 = vld [vmem:[#allocation5 + $0x48] sm:$0xff]  ;;  %v157_v28 = vld [vmem:[#allocation5 + $0x50] sm:$0xff]  ;;  %v158_v29 = vld [vmem:[#allocation5 + $0x58] sm:$0xff]  ;;  %v129_v4 = vsub.s32 %v126_v62, %v123_v61  ;;  %p649_p12 = scmp.ne.s32.totalorder %s355_s8, %s648_s10  ;;  %p654_p0 = scmp.lt.s32.totalorder %s648_s10, %s648_s10 }
  0x64   :  { %106 = vadd.xlane.f32.xlu1 %v105_v12  ;;  %479 = vmatprep.subr.bf16.mxu0 %v711_v0  ;;  %v489_v27 = vpack.c.bf16 %v156_v26, %v155_v25  ;;  %v492_v30 = vpack.c.bf16 %v158_v29, %v157_v28  ;;  %v159_v31 = vld [vmem:[#allocation5 + $0x60] sm:$0xff]  ;;  %v160_v32 = vld [vmem:[#allocation5 + $0x68] sm:$0xff]  ;;  %v161_v35 = vld [vmem:[#allocation5 + $0x70] sm:$0xff] }
  0x65   :  { %100 = vadd.xlane.f32.xlu0 %v99_v16  ;;  %v495_v34 = vpack.c.bf16 %v160_v32, %v159_v31  ;;  %v162_v36 = vld [vmem:[#allocation5 + $0x78] sm:$0xff]  ;;  %v243_v37 = vld [vmem:[#allocation8] sm:$0xff]  ;;  %v244_v38 = vld [vmem:[#allocation8 + $0x8] sm:$0xff]  ;;  %p655_p1 = por %p654_p0, %p653_p13 }
  0x66   :  { %v245_v39 = vld [vmem:[#allocation8 + $0x10] sm:$0xff]  ;;  %v501_v40 = vpack.c.bf16 %v244_v38, %v243_v37  ;;  %v246_v41 = vld [vmem:[#allocation8 + $0x18] sm:$0xff]  ;;  %v498_v42 = vpack.c.bf16 %v162_v36, %v161_v35  ;;  %v247_v44 = vld [vmem:[#allocation8 + $0x20] sm:$0xff] }
  0x67   :  { %481 = vmatpush3.bf16.msra.mxu0 %v480_v18  ;;  %v504_v43 = vpack.c.bf16 %v246_v41, %v245_v39  ;;  %v248_v45 = vld [vmem:[#allocation8 + $0x28] sm:$0xff]  ;;  %v249_v47 = vld [vmem:[#allocation8 + $0x30] sm:$0xff]  ;;  %v250_v48 = vld [vmem:[#allocation8 + $0x38] sm:$0xff]  ;;  %p656_p2 = pnand %p655_p1, %p649_p12 }
  0x68   :  { %482 = vmatprep.subr.bf16.mxu0 %v711_v0  ;;  %502 = vmatpush3.bf16.msra.mxu1 %v501_v40  ;;  %v507_v46 = vpack.c.bf16 %v248_v45, %v247_v44  ;;  %v510_v49 = vpack.c.bf16 %v250_v48, %v249_v47  ;;  %v251_v50 = vld [vmem:[#allocation8 + $0x40] sm:$0xff]  ;;  %v252_v51 = vld [vmem:[#allocation8 + $0x48] sm:$0xff]  ;;  %v253_v53 = vld [vmem:[#allocation8 + $0x50] sm:$0xff] }
  0x69   :  { %503 = vmatprep.subr.bf16.mxu1 %v711_v0  ;;  %v513_v52 = vpack.c.bf16 %v252_v51, %v251_v50  ;;  %v254_v54 = vld [vmem:[#allocation8 + $0x58] sm:$0xff]  ;;  %v255_v56 = vld [vmem:[#allocation8 + $0x60] sm:$0xff]  ;;  %v256_v57 = vld [vmem:[#allocation8 + $0x68] sm:$0xff] }
  0x6a   :  { %v516_v55 = vpack.c.bf16 %v254_v54, %v253_v53  ;;  %v519_v58 = vpack.c.bf16 %v256_v57, %v255_v56  ;;  %v257_v17 = vld [vmem:[#allocation8 + $0x70] sm:$0xff]  ;;  %v258_v18 = vld [vmem:[#allocation8 + $0x78] sm:$0xff] }
  0x6b   :  { %484 = vmatpush3.bf16.msra.mxu0 %v483_v21  ;;  %v522_v19 = vpack.c.bf16 %v258_v18, %v257_v17  ;;  %v369_v20 = vld [vmem:[#allocation7] ss:$0 sm:$0xff] }
  0x6c   :  { %485 = vmatprep.subr.bf16.mxu0 %v711_v0  ;;  %505 = vmatpush3.bf16.msra.mxu1 %v504_v43 }
  0x6d   :  { %506 = vmatprep.subr.bf16.mxu1 %v711_v0 }
  0x6f   :  { %487 = vmatpush3.bf16.msra.mxu0 %v486_v24 }
  0x70   :  { %488 = vmatprep.subr.bf16.mxu0 %v711_v0  ;;  %508 = vmatpush3.bf16.msra.mxu1 %v507_v46 }
  0x71   :  { %509 = vmatprep.subr.bf16.mxu1 %v711_v0 }
  0x73   :  { %490 = vmatpush3.bf16.msra.mxu0 %v489_v27 }
  0x74   :  { %491 = vmatprep.subr.bf16.mxu0 %v711_v0  ;;  %511 = vmatpush3.bf16.msra.mxu1 %v510_v49 }
  0x75   :  { %512 = vmatprep.subr.bf16.mxu1 %v711_v0 }
  0x77   :  { %493 = vmatpush3.bf16.msra.mxu0 %v492_v30 }
  0x78   :  { %494 = vmatprep.subr.bf16.mxu0 %v711_v0  ;;  %514 = vmatpush3.bf16.msra.mxu1 %v513_v52 }
  0x79   :  { %515 = vmatprep.subr.bf16.mxu1 %v711_v0 }
  0x7b   :  { %496 = vmatpush3.bf16.msra.mxu0 %v495_v34 }
  0x7c   :  { %497 = vmatprep.subr.bf16.mxu0 %v711_v0  ;;  %517 = vmatpush3.bf16.msra.mxu1 %v516_v55 }
  0x7d   :  { %518 = vmatprep.subr.bf16.mxu1 %v711_v0 }
  0x7f   :  { %499 = vmatpush3.bf16.msra.mxu0 %v498_v42 }
  0x80   :  { %520 = vmatpush3.bf16.msra.mxu1 %v519_v58 }
  0x81   :  { %521 = vmatprep.subr.bf16.mxu1 %v711_v0 }
  0x84   :  { %523 = vmatpush3.bf16.msra.mxu1 %v522_v19 }
  0xed   :  { %v104_v63 = vpop.xlane.xlu1 %103 }
  0xee   :  { %v98_v1 = vpop.xlane.xlu0 %97  ;;  %v114_v3 = vmul.f32 0.00390625, %v104_v63 }
  0xef   :  { %v112_v5 = vmul.f32 0.00390625, %v98_v1 }
  0xf0   :  { %v136_v10 = vrot.slane %v114_v3, %v124_v2 }
  0xf1   :  { %v107_v6 = vpop.xlane.xlu1 %106  ;;  %v125_v12 = vrot.slane %v112_v5, %v124_v2 }
  0xf2   :  { %v115_v7 = vmul.f32 0.00390625, %v107_v6  ;;  %v101_v8 = vpop.xlane.xlu0 %100 }
  0xf3   :  { %v113_v9 = vmul.f32 0.00390625, %v101_v8 }
  0xf4   :  { %v140_v11 = vrot.slane %v115_v7, %v129_v4 }
  0xf5   :  { %v130_v13 = vrot.slane %v113_v9, %v129_v4 }
  0xf6   :  { %v141_v0 = vsel %vm131_vm1, %v140_v11, %v136_v10 }
  0xf7   :  { %v132_v14 = vsel %vm131_vm1, %v130_v13, %v125_v12 }
  0xf8   :  { %v143_v15 = vsel %vm142_vm2, %v141_v0, %v132_v14 }
  0xf9   :  { %439 = vmatmul.mubr.msk.f32.vlgmr.msra.gmra.mrb[0].mxu0 %vm145_vm3, %v143_v15  ;;  %v146_v16 = vsel %vm145_vm3, %v143_v15, 0.0 }
  0xfa   :  { %337 = vst [vmem:[#allocation12] sm:$0x3] %v146_v16 }
 0x1cc   :  { %v236_v21 = vpop.f32.mrb[0].mxu0 }
 0x1cd   :  { %v237_v22 = vadd.f32 %v369_v20, %v236_v21  ;;  %v440_v23 = vpop.f32.mrb[1].mxu0 }
 0x1cf   :  { %v241_v24 = vmul.f32 0.01, %v237_v22  ;;  %vm240_vm4 = vcmp.gt.f32.partialorder %v237_v22, 0.0 }
 0x1d1   :  { %v242_v25 = vsel %vm240_vm4, %v237_v22, %v241_v24 }
 0x1d2   :  { %474 = vmatmul.mubr.f32.vlgmr.msra.gmra.mrb[0].mxu1 %v242_v25 }
 0x1d3   :  { %659 = shalt.err (!%p656_p2)
}
 0x1d4   :  { %s660_s13 = scalar_lea.hbm %s857_s6, 32 }
 0x1d5   :  { %p661_p3 = scmp.ne.s32.totalorder %s857_s6, %s660_s13  ;;  %p664_p4 = scmp.lt.u32.totalorder %s660_s13, %s857_s6 }
 0x1d7   :  { %p666_p5 = pnand %p664_p4, %p661_p3 }
 0x1d9   :  { %669 = shalt.err (!%p666_p5)
}
 0x1da   :  { %357 = dma.vmem_to_hbm [thread:$0]  %s355_s8, 32, %s857_s6, [#allocation13]   ;;  %v371_v26 = vld [vmem:[#allocation10] ss:$0 sm:$0xff] }
 0x1db   :  { %s715_s21 = smov [#allocation11]  }
 0x1dc   :  { %s344_s1 = sshll.u32 %s715_s21, 4  ;;  %s345_s1 = int_to_ptr.vmem [resolvable:$true] %s344_s1 }
 0x1dd   :  { %s670_s0 = scalar_lea.vmem %s345_s1, 32  ;;  %p675_p7 = scmp.lt.s32.totalorder %s345_s1, %s345_s1 }
 0x1de   :  { %p671_p6 = scmp.ne.s32.totalorder %s345_s1, %s670_s0  ;;  %p676_p8 = scmp.lt.s32.totalorder %s670_s0, %s670_s0 }
 0x1e0   :  { %p677_p9 = por %p676_p8, %p675_p7 }
 0x1e2   :  { %p678_p10 = pnand %p677_p9, %p671_p6 }
 0x2a5   :  { %v332_v27 = vpop.f32.mrb[0].mxu1 }
 0x2a6   :  { %v333_v28 = vadd.f32 %v371_v26, %v332_v27  ;;  %v475_v29 = vpop.f32.mrb[1].mxu1 }
 0x2a8   :  { %336 = vst [vmem:[#allocation11] sm:$0x3] %v333_v28 }
 0x2a9   :  { %681 = shalt.err (!%p678_p10)
}
 0x2aa   :  { %s682_s23 = scalar_lea.hbm %s856_s5, 32 }
 0x2ab   :  { %p683_p11 = scmp.ne.s32.totalorder %s856_s5, %s682_s23  ;;  %p686_p12 = scmp.lt.u32.totalorder %s682_s23, %s856_s5 }
 0x2ad   :  { %p688_p13 = pnand %p686_p12, %p683_p11 }
 0x2af   :  { %691 = shalt.err (!%p688_p13)
}
 0x2b0   :  { %347 = dma.vmem_to_hbm [thread:$0]  %s345_s1, 32, %s856_s5, [#allocation4]  }
 0x2b1   :  { %698 = dma.done.wait [#allocation4], 32  }
 0x2b2   :  { %699 = vsyncadd [#allocation4], 4294967264 }
 0x2b3   :  { %700 = dma.done.wait [#allocation13], 32  }
 0x2b4   :  { %701 = vsyncadd [#allocation13], 4294967264 }
 0x2b5   :  { %364 = vsyncpa [#allocation3], 1 }
 0x2b6   :  { %365 = vsyncpa [#allocation6], 1 }
 0x2b7   :  { %366 = vsyncpa [#allocation9], 1 }
 0x2b8   :  { %367 = vsyncpa [#allocation4], 1 }
 0x2b9   :  { %368 = vsyncpa [#allocation13], 1 }

// kernel: head_forward.1
= control target key start
LH: loop header
LB: loop body
LE: loop exit
PB: predicated region body
PF: predicated region fallthrough
CT: control target
= control target key end

     0   :  { %12 = vsyncpa [#allocation3], 0  ;;  %s851_s0 = inlined_call_operand.hbm [shape: f32[2,16,256], index: 0, kind: input, shape index: {}]   ;;  %s852_s1 = inlined_call_operand.hbm [shape: f32[128,128], index: 1, kind: input, shape index: {}]   ;;  %s853_s2 = inlined_call_operand.hbm [shape: f32[1,128], index: 2, kind: input, shape index: {}]   ;;  %s854_s3 = inlined_call_operand.hbm [shape: f32[128,128], index: 3, kind: input, shape index: {}]   ;;  %s855_s4 = inlined_call_operand.hbm [shape: f32[1,128], index: 4, kind: input, shape index: {}]   ;;  %s856_s5 = inlined_call_operand.hbm [shape: f32[2,128], index: 5, kind: output, shape index: {0}]   ;;  %s857_s6 = inlined_call_operand.hbm [shape: f32[2,128], index: 6, kind: output, shape index: {1}]  }
   0x1   :  { %13 = vsyncpa [#allocation6], 0 }
   0x2   :  { %14 = vsyncpa [#allocation9], 0 }
   0x3   :  { %15 = vsyncpa [#allocation4], 0 }
   0x4   :  { %16 = vsyncpa [#allocation13], 0  ;;  %s702_s21 = smov [#allocation5]   ;;  %s538_s25 = scalar_lea.hbm %s852_s1, 2048 }
   0x5   :  { %s34_s22 = sshll.u32 %s702_s21, 4  ;;  %p539_p0 = scmp.ne.s32.totalorder %s852_s1, %s538_s25  ;;  %s35_s22 = int_to_ptr.vmem [resolvable:$true] %s34_s22 }
   0x6   :  { %p542_p1 = scmp.lt.u32.totalorder %s538_s25, %s852_s1 }
   0x8   :  { %p544_p2 = pnand %p542_p1, %p539_p0 }
   0xa   :  { %547 = shalt.err (!%p544_p2)
}
   0xb   :  { %s548_s30 = scalar_lea.vmem %s35_s22, 2048  ;;  %p553_p4 = scmp.lt.s32.totalorder %s35_s22, %s35_s22 }
   0xc   :  { %p549_p3 = scmp.ne.s32.totalorder %s35_s22, %s548_s30  ;;  %p554_p5 = scmp.lt.s32.totalorder %s548_s30, %s548_s30 }
   0xe   :  { %p555_p6 = por %p554_p5, %p553_p4 }
  0x10   :  { %p556_p7 = pnand %p555_p6, %p549_p3 }
  0x12   :  { %559 = shalt.err (!%p556_p7)
}
  0x13   :  { %s703_s7 = smov 128   ;;  %s704_s8 = smov 8  }
  0x14   :  { %40 = dma.hbm_to_vmem [thread:$0]  %s852_s1, 2048, %s35_s22, [#allocation6], %s703_s7, %s703_s7, %s704_s8  }
  0x15   :  { %s705_s11 = smov [#allocation8]   ;;  %s706_s13 = smov [#allocation2]  }
  0x16   :  { %s56_s12 = sshll.u32 %s705_s11, 4  ;;  %s22_s14 = sshll.u32 %s706_s13, 4  ;;  %s57_s12 = int_to_ptr.vmem [resolvable:$true] %s56_s12  ;;  %s23_s14 = int_to_ptr.vmem [resolvable:$true] %s22_s14 }
  0x17   :  { %s560_s17 = scalar_lea.hbm %s854_s3, 2048 }
  0x18   :  { %p561_p8 = scmp.ne.s32.totalorder %s854_s3, %s560_s17  ;;  %p564_p9 = scmp.lt.u32.totalorder %s560_s17, %s854_s3 }
  0x1a   :  { %p566_p10 = pnand %p564_p9, %p561_p8 }
  0x1c   :  { %569 = shalt.err (!%p566_p10)
}
  0x1d   :  { %s570_s1 = scalar_lea.vmem %s57_s12, 2048  ;;  %p575_p12 = scmp.lt.s32.totalorder %s57_s12, %s57_s12 }
  0x1e   :  { %p571_p11 = scmp.ne.s32.totalorder %s57_s12, %s570_s1  ;;  %p576_p13 = scmp.lt.s32.totalorder %s570_s1, %s570_s1 }
  0x20   :  { %p577_p0 = por %p576_p13, %p575_p12 }
  0x22   :  { %p578_p1 = pnand %p577_p0, %p571_p11 }
  0x24   :  { %581 = shalt.err (!%p578_p1)
}
  0x25   :  { %62 = dma.hbm_to_vmem [thread:$0]  %s854_s3, 2048, %s57_s12, [#allocation9], %s703_s7, %s703_s7, %s704_s8  }
  0x26   :  { %s582_s26 = scalar_lea.hbm %s851_s0, 1024 }
  0x27   :  { %p583_p2 = scmp.ne.s32.totalorder %s851_s0, %s582_s26  ;;  %p586_p3 = scmp.lt.u32.totalorder %s582_s26, %s851_s0 }
  0x29   :  { %p588_p4 = pnand %p586_p3, %p583_p2 }
  0x2b   :  { %591 = shalt.err (!%p588_p4)
}
  0x2c   :  { %s592_s9 = scalar_lea.vmem %s23_s14, 1024  ;;  %p597_p6 = scmp.lt.s32.totalorder %s23_s14, %s23_s14 }
  0x2d   :  { %p593_p5 = scmp.ne.s32.totalorder %s23_s14, %s592_s9  ;;  %p598_p7 = scmp.lt.s32.totalorder %s592_s9, %s592_s9 }
  0x2f   :  { %p599_p8 = por %p598_p7, %p597_p6 }
  0x31   :  { %p600_p9 = pnand %p599_p8, %p593_p5 }
  0x33   :  { %603 = shalt.err (!%p600_p9)
}
  0x34   :  { %s707_s3 = smov 256   ;;  %s708_s7 = smov 16  }
  0x35   :  { %28 = dma.hbm_to_vmem [thread:$0]  %s851_s0, 1024, %s23_s14, [#allocation3], %s707_s3, %s707_s3, %s708_s7  }
  0x36   :  { %s709_s11 = smov [#allocation7]   ;;  %s710_s13 = smov [#allocation10]  }
  0x37   :  { %s47_s12 = sshll.u32 %s709_s11, 4  ;;  %s69_s15 = sshll.u32 %s710_s13, 4  ;;  %s48_s12 = int_to_ptr.vmem [resolvable:$true] %s47_s12  ;;  %s70_s15 = int_to_ptr.vmem [resolvable:$true] %s69_s15 }
  0x38   :  { %s604_s18 = scalar_lea.hbm %s853_s2, 16 }
  0x39   :  { %p605_p10 = scmp.ne.s32.totalorder %s853_s2, %s604_s18  ;;  %p608_p11 = scmp.lt.u32.totalorder %s604_s18, %s853_s2 }
  0x3b   :  { %p610_p12 = pnand %p608_p11, %p605_p10 }
  0x3d   :  { %613 = shalt.err (!%p610_p12)
}
  0x3e   :  { %s614_s0 = scalar_lea.vmem %s48_s12, 16  ;;  %s618_s14 = scalar_lea.vmem %s48_s12, 32 }
  0x3f   :  { %p615_p13 = scmp.ne.s32.totalorder %s48_s12, %s614_s0  ;;  %p619_p0 = scmp.lt.s32.totalorder %s48_s12, %s48_s12 }
  0x40   :  { %p620_p1 = scmp.lt.s32.totalorder %s618_s14, %s614_s0 }
  0x42   :  { %p621_p2 = por %p620_p1, %p619_p0 }
  0x44   :  { %p622_p3 = pnand %p621_p2, %p615_p13 }
  0x46   :  { %625 = shalt.err (!%p622_p3)
}
  0x47   :  { %50 = dma.hbm_to_vmem [thread:$0]  %s853_s2, 16, %s48_s12, [#allocation6]  }
  0x48   :  { %s626_s26 = scalar_lea.hbm %s855_s4, 16 }
  0x49   :  { %p627_p4 = scmp.ne.s32.totalorder %s855_s4, %s626_s26  ;;  %p630_p5 = scmp.lt.u32.totalorder %s626_s26, %s855_s4 }
  0x4b   :  { %p632_p6 = pnand %p630_p5, %p627_p4 }
  0x4d   :  { %635 = shalt.err (!%p632_p6)
}
  0x4e   :  { %s636_s9 = scalar_lea.vmem %s70_s15, 16  ;;  %s640_s3 = scalar_lea.vmem %s70_s15, 32 }
  0x4f   :  { %p637_p7 = scmp.ne.s32.totalorder %s70_s15, %s636_s9  ;;  %p641_p8 = scmp.lt.s32.totalorder %s70_s15, %s70_s15 }
  0x50   :  { %p642_p9 = scmp.lt.s32.totalorder %s640_s3, %s636_s9 }
  0x52   :  { %p643_p10 = por %p642_p9, %p641_p8 }
  0x54   :  { %p644_p11 = pnand %p643_p10, %p637_p7 }
  0x56   :  { %647 = shalt.err (!%p644_p11)
}
  0x57   :  { %72 = dma.hbm_to_vmem [thread:$0]  %s855_s4, 16, %s70_s15, [#allocation9]  }
  0x58   :  { %692 = dma.done.wait [#allocation3], 1024  }
  0x59   :  { %693 = vsyncadd [#allocation3], 4294966272 }
  0x5a   :  { %694 = dma.done.wait [#allocation6], 2064  }
  0x5b   :  { %695 = vsyncadd [#allocation6], 4294965232 }
  0x5c   :  { %696 = dma.done.wait [#allocation9], 2064  }
  0x5d   :  { %697 = vsyncadd [#allocation9], 4294965232  ;;  %v711_v0 = vmov 0.0|0.0   ;;  %v92_v1 = vld [vmem:[#allocation2 + $0x20] sm:$0xff]  ;;  %v93_v2 = vld [vmem:[#allocation2 + $0x28] sm:$0xff]  ;;  %vm712_vm0 = vmmov 0   ;;  %v120_v59 = vlaneseq }
  0x5e   :  { %476 = vmatprep.subr.bf16.mxu0 %v711_v0  ;;  %500 = vmatprep.subr.bf16.mxu1 %v711_v0  ;;  %v88_v3 = vld [vmem:[#allocation2] sm:$0xff]  ;;  %v102_v4 = vadd.f32 %v93_v2, %v92_v1  ;;  %v89_v5 = vld [vmem:[#allocation2 + $0x8] sm:$0xff]  ;;  %v94_v6 = vld [vmem:[#allocation2 + $0x30] sm:$0xff]  ;;  %v713_v33 = vmov 0.0   ;;  %vm131_vm1 = vcmask 130112   ;;  %vm142_vm2 = vcmask 1041409  }
  0x5f   :  { %v95_v7 = vld [vmem:[#allocation2 + $0x38] sm:$0xff]  ;;  %v96_v8 = vadd.f32 %v89_v5, %v88_v3  ;;  %v90_v9 = vld [vmem:[#allocation2 + $0x10] sm:$0xff]  ;;  %v147_v11 = vld [vmem:[#allocation5] sm:$0xff]  ;;  %438 = vmatprep.mubr.msk.f32.mxu0 %vm712_vm0, %v713_v33  ;;  %473 = vmatprep.mubr.msk.f32.mxu1 %vm712_vm0, %v713_v33  ;;  %v121_v60 = vand.u32 127, %v120_v59  ;;  %v123_v61 = vshrl.u32 %v120_v59, 7  ;;  %vm145_vm3 = vcmask 130048  }
  0x60   :  { %v91_v10 = vld [vmem:[#allocation2 + $0x18] sm:$0xff]  ;;  %103 = vadd.xlane.f32.xlu1 %v102_v4  ;;  %v105_v12 = vadd.f32 %v95_v7, %v94_v6  ;;  %v148_v13 = vld [vmem:[#allocation5 + $0x8] sm:$0xff]  ;;  %v149_v14 = vld [vmem:[#allocation5 + $0x10] sm:$0xff]  ;;  %s714_s4 = smov [#allocation12]  }
  0x61   :  { %v150_v15 = vld [vmem:[#allocation5 + $0x18] sm:$0xff]  ;;  %97 = vadd.xlane.f32.xlu0 %v96_v8  ;;  %v99_v16 = vadd.f32 %v91_v10, %v90_v9  ;;  %v477_v17 = vpack.c.bf16 %v148_v13, %v147_v11  ;;  %v151_v19 = vld [vmem:[#allocation5 + $0x20] sm:$0xff]  ;;  %v152_v20 = vld [vmem:[#allocation5 + $0x28] sm:$0xff]  ;;  %v126_v62 = vadd.s32 4294967288, %v121_v60  ;;  %v124_v2 = vsub.s32 %v121_v60, %v123_v61  ;;  %s354_s8 = sshll.u32 %s714_s4, 4  ;;  %s355_s8 = int_to_ptr.vmem [resolvable:$true] %s354_s8 }
  0x62   :  { %v480_v18 = vpack.c.bf16 %v150_v15, %v149_v14  ;;  %v483_v21 = vpack.c.bf16 %v152_v20, %v151_v19  ;;  %v153_v22 = vld [vmem:[#allocation5 + $0x30] sm:$0xff]  ;;  %v154_v23 = vld [vmem:[#allocation5 + $0x38] sm:$0xff]  ;;  %v155_v25 = vld [vmem:[#allocation5 + $0x40] sm:$0xff]  ;;  %s648_s10 = scalar_lea.vmem %s355_s8, 32  ;;  %p653_p13 = scmp.lt.s32.totalorder %s355_s8, %s355_s8 }
  0x63   :  { %478 = vmatpush3.bf16.msra.mxu0 %v477_v17  ;;  %v486_v24 = vpack.c.bf16 %v154_v23, %v153_v22  ;;  %v156_v26 = vld [vmem:[#allocation5 + $0x48] sm:$0xff]  ;;  %v157_v28 = vld [vmem:[#allocation5 + $0x50] sm:$0xff]  ;;  %v158_v29 = vld [vmem:[#allocation5 + $0x58] sm:$0xff]  ;;  %v129_v4 = vsub.s32 %v126_v62, %v123_v61  ;;  %p649_p12 = scmp.ne.s32.totalorder %s355_s8, %s648_s10  ;;  %p654_p0 = scmp.lt.s32.totalorder %s648_s10, %s648_s10 }
  0x64   :  { %106 = vadd.xlane.f32.xlu1 %v105_v12  ;;  %479 = vmatprep.subr.bf16.mxu0 %v711_v0  ;;  %v489_v27 = vpack.c.bf16 %v156_v26, %v155_v25  ;;  %v492_v30 = vpack.c.bf16 %v158_v29, %v157_v28  ;;  %v159_v31 = vld [vmem:[#allocation5 + $0x60] sm:$0xff]  ;;  %v160_v32 = vld [vmem:[#allocation5 + $0x68] sm:$0xff]  ;;  %v161_v35 = vld [vmem:[#allocation5 + $0x70] sm:$0xff] }
  0x65   :  { %100 = vadd.xlane.f32.xlu0 %v99_v16  ;;  %v495_v34 = vpack.c.bf16 %v160_v32, %v159_v31  ;;  %v162_v36 = vld [vmem:[#allocation5 + $0x78] sm:$0xff]  ;;  %v243_v37 = vld [vmem:[#allocation8] sm:$0xff]  ;;  %v244_v38 = vld [vmem:[#allocation8 + $0x8] sm:$0xff]  ;;  %p655_p1 = por %p654_p0, %p653_p13 }
  0x66   :  { %v245_v39 = vld [vmem:[#allocation8 + $0x10] sm:$0xff]  ;;  %v501_v40 = vpack.c.bf16 %v244_v38, %v243_v37  ;;  %v246_v41 = vld [vmem:[#allocation8 + $0x18] sm:$0xff]  ;;  %v498_v42 = vpack.c.bf16 %v162_v36, %v161_v35  ;;  %v247_v44 = vld [vmem:[#allocation8 + $0x20] sm:$0xff] }
  0x67   :  { %481 = vmatpush3.bf16.msra.mxu0 %v480_v18  ;;  %v504_v43 = vpack.c.bf16 %v246_v41, %v245_v39  ;;  %v248_v45 = vld [vmem:[#allocation8 + $0x28] sm:$0xff]  ;;  %v249_v47 = vld [vmem:[#allocation8 + $0x30] sm:$0xff]  ;;  %v250_v48 = vld [vmem:[#allocation8 + $0x38] sm:$0xff]  ;;  %p656_p2 = pnand %p655_p1, %p649_p12 }
  0x68   :  { %482 = vmatprep.subr.bf16.mxu0 %v711_v0  ;;  %502 = vmatpush3.bf16.msra.mxu1 %v501_v40  ;;  %v507_v46 = vpack.c.bf16 %v248_v45, %v247_v44  ;;  %v510_v49 = vpack.c.bf16 %v250_v48, %v249_v47  ;;  %v251_v50 = vld [vmem:[#allocation8 + $0x40] sm:$0xff]  ;;  %v252_v51 = vld [vmem:[#allocation8 + $0x48] sm:$0xff]  ;;  %v253_v53 = vld [vmem:[#allocation8 + $0x50] sm:$0xff] }
  0x69   :  { %503 = vmatprep.subr.bf16.mxu1 %v711_v0  ;;  %v513_v52 = vpack.c.bf16 %v252_v51, %v251_v50  ;;  %v254_v54 = vld [vmem:[#allocation8 + $0x58] sm:$0xff]  ;;  %v255_v56 = vld [vmem:[#allocation8 + $0x60] sm:$0xff]  ;;  %v256_v57 = vld [vmem:[#allocation8 + $0x68] sm:$0xff] }
  0x6a   :  { %v516_v55 = vpack.c.bf16 %v254_v54, %v253_v53  ;;  %v519_v58 = vpack.c.bf16 %v256_v57, %v255_v56  ;;  %v257_v17 = vld [vmem:[#allocation8 + $0x70] sm:$0xff]  ;;  %v258_v18 = vld [vmem:[#allocation8 + $0x78] sm:$0xff] }
  0x6b   :  { %484 = vmatpush3.bf16.msra.mxu0 %v483_v21  ;;  %v522_v19 = vpack.c.bf16 %v258_v18, %v257_v17  ;;  %v369_v20 = vld [vmem:[#allocation7] ss:$0 sm:$0xff] }
  0x6c   :  { %485 = vmatprep.subr.bf16.mxu0 %v711_v0  ;;  %505 = vmatpush3.bf16.msra.mxu1 %v504_v43 }
  0x6d   :  { %506 = vmatprep.subr.bf16.mxu1 %v711_v0 }
  0x6f   :  { %487 = vmatpush3.bf16.msra.mxu0 %v486_v24 }
  0x70   :  { %488 = vmatprep.subr.bf16.mxu0 %v711_v0  ;;  %508 = vmatpush3.bf16.msra.mxu1 %v507_v46 }
  0x71   :  { %509 = vmatprep.subr.bf16.mxu1 %v711_v0 }
  0x73   :  { %490 = vmatpush3.bf16.msra.mxu0 %v489_v27 }
  0x74   :  { %491 = vmatprep.subr.bf16.mxu0 %v711_v0  ;;  %511 = vmatpush3.bf16.msra.mxu1 %v510_v49 }
  0x75   :  { %512 = vmatprep.subr.bf16.mxu1 %v711_v0 }
  0x77   :  { %493 = vmatpush3.bf16.msra.mxu0 %v492_v30 }
  0x78   :  { %494 = vmatprep.subr.bf16.mxu0 %v711_v0  ;;  %514 = vmatpush3.bf16.msra.mxu1 %v513_v52 }
  0x79   :  { %515 = vmatprep.subr.bf16.mxu1 %v711_v0 }
  0x7b   :  { %496 = vmatpush3.bf16.msra.mxu0 %v495_v34 }
  0x7c   :  { %497 = vmatprep.subr.bf16.mxu0 %v711_v0  ;;  %517 = vmatpush3.bf16.msra.mxu1 %v516_v55 }
  0x7d   :  { %518 = vmatprep.subr.bf16.mxu1 %v711_v0 }
  0x7f   :  { %499 = vmatpush3.bf16.msra.mxu0 %v498_v42 }
  0x80   :  { %520 = vmatpush3.bf16.msra.mxu1 %v519_v58 }
  0x81   :  { %521 = vmatprep.subr.bf16.mxu1 %v711_v0 }
  0x84   :  { %523 = vmatpush3.bf16.msra.mxu1 %v522_v19 }
  0xed   :  { %v104_v63 = vpop.xlane.xlu1 %103 }
  0xee   :  { %v98_v1 = vpop.xlane.xlu0 %97  ;;  %v114_v3 = vmul.f32 0.00390625, %v104_v63 }
  0xef   :  { %v112_v5 = vmul.f32 0.00390625, %v98_v1 }
  0xf0   :  { %v136_v10 = vrot.slane %v114_v3, %v124_v2 }
  0xf1   :  { %v107_v6 = vpop.xlane.xlu1 %106  ;;  %v125_v12 = vrot.slane %v112_v5, %v124_v2 }
  0xf2   :  { %v115_v7 = vmul.f32 0.00390625, %v107_v6  ;;  %v101_v8 = vpop.xlane.xlu0 %100 }
  0xf3   :  { %v113_v9 = vmul.f32 0.00390625, %v101_v8 }
  0xf4   :  { %v140_v11 = vrot.slane %v115_v7, %v129_v4 }
  0xf5   :  { %v130_v13 = vrot.slane %v113_v9, %v129_v4 }
  0xf6   :  { %v141_v0 = vsel %vm131_vm1, %v140_v11, %v136_v10 }
  0xf7   :  { %v132_v14 = vsel %vm131_vm1, %v130_v13, %v125_v12 }
  0xf8   :  { %v143_v15 = vsel %vm142_vm2, %v141_v0, %v132_v14 }
  0xf9   :  { %439 = vmatmul.mubr.msk.f32.vlgmr.msra.gmra.mrb[0].mxu0 %vm145_vm3, %v143_v15  ;;  %v146_v16 = vsel %vm145_vm3, %v143_v15, 0.0 }
  0xfa   :  { %337 = vst [vmem:[#allocation12] sm:$0x3] %v146_v16 }
 0x1cc   :  { %v236_v21 = vpop.f32.mrb[0].mxu0 }
 0x1cd   :  { %v237_v22 = vadd.f32 %v369_v20, %v236_v21  ;;  %v440_v23 = vpop.f32.mrb[1].mxu0 }
 0x1cf   :  { %v241_v24 = vmul.f32 0.01, %v237_v22  ;;  %vm240_vm4 = vcmp.gt.f32.partialorder %v237_v22, 0.0 }
 0x1d1   :  { %v242_v25 = vsel %vm240_vm4, %v237_v22, %v241_v24 }
 0x1d2   :  { %474 = vmatmul.mubr.f32.vlgmr.msra.gmra.mrb[0].mxu1 %v242_v25 }
 0x1d3   :  { %659 = shalt.err (!%p656_p2)
}
 0x1d4   :  { %s660_s13 = scalar_lea.hbm %s857_s6, 32 }
 0x1d5   :  { %p661_p3 = scmp.ne.s32.totalorder %s857_s6, %s660_s13  ;;  %p664_p4 = scmp.lt.u32.totalorder %s660_s13, %s857_s6 }
 0x1d7   :  { %p666_p5 = pnand %p664_p4, %p661_p3 }
 0x1d9   :  { %669 = shalt.err (!%p666_p5)
}
 0x1da   :  { %357 = dma.vmem_to_hbm [thread:$0]  %s355_s8, 32, %s857_s6, [#allocation13]   ;;  %v371_v26 = vld [vmem:[#allocation10] ss:$0 sm:$0xff] }
 0x1db   :  { %s715_s21 = smov [#allocation11]  }
 0x1dc   :  { %s344_s1 = sshll.u32 %s715_s21, 4  ;;  %s345_s1 = int_to_ptr.vmem [resolvable:$true] %s344_s1 }
 0x1dd   :  { %s670_s0 = scalar_lea.vmem %s345_s1, 32  ;;  %p675_p7 = scmp.lt.s32.totalorder %s345_s1, %s345_s1 }
 0x1de   :  { %p671_p6 = scmp.ne.s32.totalorder %s345_s1, %s670_s0  ;;  %p676_p8 = scmp.lt.s32.totalorder %s670_s0, %s670_s0 }
 0x1e0   :  { %p677_p9 = por %p676_p8, %p675_p7 }
 0x1e2   :  { %p678_p10 = pnand %p677_p9, %p671_p6 }
 0x2a5   :  { %v332_v27 = vpop.f32.mrb[0].mxu1 }
 0x2a6   :  { %v333_v28 = vadd.f32 %v371_v26, %v332_v27  ;;  %v475_v29 = vpop.f32.mrb[1].mxu1 }
 0x2a8   :  { %336 = vst [vmem:[#allocation11] sm:$0x3] %v333_v28 }
 0x2a9   :  { %681 = shalt.err (!%p678_p10)
}
 0x2aa   :  { %s682_s23 = scalar_lea.hbm %s856_s5, 32 }
 0x2ab   :  { %p683_p11 = scmp.ne.s32.totalorder %s856_s5, %s682_s23  ;;  %p686_p12 = scmp.lt.u32.totalorder %s682_s23, %s856_s5 }
 0x2ad   :  { %p688_p13 = pnand %p686_p12, %p683_p11 }
 0x2af   :  { %691 = shalt.err (!%p688_p13)
}
 0x2b0   :  { %347 = dma.vmem_to_hbm [thread:$0]  %s345_s1, 32, %s856_s5, [#allocation4]  }
 0x2b1   :  { %698 = dma.done.wait [#allocation4], 32  }
 0x2b2   :  { %699 = vsyncadd [#allocation4], 4294967264 }
 0x2b3   :  { %700 = dma.done.wait [#allocation13], 32  }
 0x2b4   :  { %701 = vsyncadd [#allocation13], 4294967264 }
 0x2b5   :  { %364 = vsyncpa [#allocation3], 1 }
 0x2b6   :  { %365 = vsyncpa [#allocation6], 1 }
 0x2b7   :  { %366 = vsyncpa [#allocation9], 1 }
 0x2b8   :  { %367 = vsyncpa [#allocation4], 1 }
 0x2b9   :  { %368 = vsyncpa [#allocation13], 1 }

</bundles_post_ra>
